<compile_context>
chip_gen: v7x
topology: tpu7x:2x2x1
jax: 0.10.0
libtpu: 0.0.40
codegen_flags: <defaults>
</compile_context>

<pallas_src>
import functools

import jax
import jax.numpy as jnp
from jax.experimental import pallas as pl
from jax.experimental.pallas import tpu as pltpu


# ------------------------------ tiling knobs --------------------------------

_LANE = 1024        # lane width of the 2-D slab (multiple of 128)
_BLOCK_ROWS = 512   # sublane rows per grid step (multiple of 8) -> ~2 MiB f32 tile


# ----------------------------- Pallas kernel --------------------------------

def _make_neg_scale_kernel(neg_alpha):
    """Backward kernel: o = g * (-alpha), with -alpha baked in as a constant."""

    def kernel(g_ref, o_ref):
        o_ref[...] = g_ref[...] * neg_alpha

    return kernel


# ------------------------------- wrapper -------------------------------------

def _reverse_grad_pallas(g, alpha):
    """Compute (-alpha) * g with a tiled, pipelined Pallas kernel."""
    neg_alpha = -float(alpha)
    orig_shape = g.shape
    n = g.size

    # Flatten and pad to a multiple of the lane width -> lane-dense 2-D slab.
    flat = g.reshape(-1)
    padded_n = ((n + _LANE - 1) // _LANE) * _LANE
    if padded_n != n:
        flat = jnp.pad(flat, (0, padded_n - n))
    rows = padded_n // _LANE
    g2 = flat.reshape(rows, _LANE)

    # Choose row-block: full array if small, otherwise tile and pad rows so the
    # grid divides evenly (keeps every block shape (8,128)-aligned).
    if rows <= _BLOCK_ROWS:
        block_rows = rows                       # block == full array dims
    else:
        block_rows = _BLOCK_ROWS
        rem = rows % block_rows
        if rem:
            g2 = jnp.pad(g2, ((0, block_rows - rem), (0, 0)))
            rows += block_rows - rem

    grid = (rows // block_rows,)

    out2 = pl.pallas_call(
        _make_neg_scale_kernel(neg_alpha),
        out_shape=jax.ShapeDtypeStruct((rows, _LANE), g2.dtype),
        grid=grid,
        in_specs=[pl.BlockSpec((block_rows, _LANE), lambda i: (i, 0))],
        out_specs=pl.BlockSpec((block_rows, _LANE), lambda i: (i, 0)),
        input_output_aliases={0: 0},
        compiler_params=pltpu.CompilerParams(
            dimension_semantics=("parallel",)),
    )(g2)

    return out2.reshape(-1)[:n].reshape(orig_shape)


# ------------------------ GradientReversalLayer ------------------------------

@functools.partial(jax.custom_vjp, nondiff_argnums=(1,))
def gradient_reversal(x, alpha=1.0):
    """Forward: identity (x.view_as(x)). Backward: grad -> -alpha * grad."""
    return x


def _grl_fwd(x, alpha):
    # Identity forward: no kernel, no HBM traffic.
    return x, None


def _grl_bwd(alpha, _res, g):
    return (_reverse_grad_pallas(g, alpha),)


gradient_reversal.defvjp(_grl_fwd, _grl_bwd)


class GradientReversalLayer:
    """JAX/Pallas equivalent of the PyTorch GradientReversalLayer."""

    def __init__(self, alpha=1.0):
        self.alpha = float(alpha)  # no learnable parameters

    def __call__(self, x):
        return gradient_reversal(x, self.alpha)


# --------------------------------- main ---------------------------------------

if __name__ == "__main__":
    key = jax.random.PRNGKey(0)

    # NCHW input, consistent with ResNet-style usage.
    x = jax.random.normal(key, (2, 4, 16, 16), dtype=jnp.float32)

    layer = GradientReversalLayer(alpha=1.0)
    y = layer(x)
    y = jax.block_until_ready(y)

    # Forward must be exact identity (shape, dtype, values).
    assert y.shape == x.shape and y.dtype == x.dtype
    assert bool(jnp.all(y == x))

    # Reversed gradient: d/dx sum(grl(x, alpha)) == -alpha everywhere.
    grad1 = jax.grad(lambda v: jnp.sum(gradient_reversal(v, 1.0)))(x)
    grad1 = jax.block_until_ready(grad1)
    assert bool(jnp.allclose(grad1, -jnp.ones_like(x)))

    grad25 = jax.grad(lambda v: jnp.sum(gradient_reversal(v, 2.5)))(x)
    grad25 = jax.block_until_ready(grad25)
    assert bool(jnp.allclose(grad25, -2.5 * jnp.ones_like(x)))

    # Ragged (non-multiple-of-128) shape exercises the pad/slice path.
    x2 = jax.random.normal(jax.random.PRNGKey(1), (2, 3, 5, 7), dtype=jnp.float32)
    grad_r = jax.grad(lambda v: jnp.sum(gradient_reversal(v, 1.0)))(x2)
    grad_r = jax.block_until_ready(grad_r)
    assert grad_r.shape == x2.shape
    assert bool(jnp.allclose(grad_r, -jnp.ones_like(x2)))

    print("KERNEL_OK")
</pallas_src>

<mosaic_0001>
module attributes {stable_mosaic.version = 11 : i64} {
  func.func @kernel(%arg0: i32, %arg1: memref<2x1024xf32, #tpu.memory_space<vmem>>, %arg2: memref<2x1024xf32, #tpu.memory_space<vmem>>) attributes {dimension_semantics = [#tpu.dimension_semantics<parallel>], iteration_bounds = array<i64: 1>, scalar_prefetch = 0 : i64, scratch_operands = 0 : i64, tpu.core_type = #tpu.core_type<tc>, window_params = [{transform_indices = @transform_0, window_bounds = array<i64: 2, 1024>}, {transform_indices = @transform_1, window_bounds = array<i64: 2, 1024>}]} {
    %c0 = arith.constant 0 : index
    %c0_0 = arith.constant 0 : index
    %0 = vector.load %arg1[%c0, %c0_0] : memref<2x1024xf32, #tpu.memory_space<vmem>>, vector<2x1024xf32>
    %cst = arith.constant -1.000000e+00 : f32
    %1 = vector.broadcast %cst : f32 to vector<2x1024xf32>
    %2 = arith.mulf %0, %1 : vector<2x1024xf32>
    %c0_1 = arith.constant 0 : index
    %c0_2 = arith.constant 0 : index
    %3 = vector.load %arg2[%c0_1, %c0_2] : memref<2x1024xf32, #tpu.memory_space<vmem>>, vector<2x1024xf32>
    tpu.vector_store %arg2[%c0_1, %c0_2], %2 {strides = array<i32>} : memref<2x1024xf32, #tpu.memory_space<vmem>>, vector<2x1024xf32>,
    return
  }
  func.func @transform_0(%arg0: i32) -> (i32, i32) {
    %c0_i32 = arith.constant 0 : i32
    %c0_i32_0 = arith.constant 0 : i32
    return %arg0, %c0_i32 : i32, i32
  }
  func.func @transform_1(%arg0: i32) -> (i32, i32) {
    %c0_i32 = arith.constant 0 : i32
    %c0_i32_0 = arith.constant 0 : i32
    return %arg0, %c0_i32 : i32, i32
  }
}

</mosaic_0001>

<bundles_post_ra>
// kernel: tpu_custom_call.1
= control target key start
LH: loop header
LB: loop body
LE: loop exit
PB: predicated region body
PF: predicated region fallthrough
CT: control target
= control target key end

     0   :  { %6 = vsyncpa [#allocation3], 0  ;;  %s128_s0 = inlined_call_operand.hbm [shape: f32[2,1024], index: 0, kind: input, shape index: {}, may-alias: {0,1}]   ;;  %s129_s1 = inlined_call_operand.hbm [shape: f32[2,1024], index: 1, kind: output, shape index: {}, may-alias: {0,1}]  }
   0x1   :  { %7 = vsyncpa [#allocation4], 0  ;;  %s92_s6 = smov [#allocation2]   ;;  %s44_s10 = scalar_lea.hbm %s128_s0, 256 }
   0x2   :  { %s14_s7 = sshll.u32 %s92_s6, 4  ;;  %p45_p0 = scmp.ne.s32.totalorder %s128_s0, %s44_s10  ;;  %s15_s7 = int_to_ptr.vmem [resolvable:$true] %s14_s7 }
   0x3   :  { %p48_p1 = scmp.lt.u32.totalorder %s44_s10, %s128_s0 }
   0x5   :  { %p50_p2 = pnand %p48_p1, %p45_p0 }
   0x7   :  { %53 = shalt.err (!%p50_p2)
}
   0x8   :  { %s54_s15 = scalar_lea.vmem %s15_s7, 256  ;;  %p59_p4 = scmp.lt.s32.totalorder %s15_s7, %s15_s7 }
   0x9   :  { %p55_p3 = scmp.ne.s32.totalorder %s15_s7, %s54_s15  ;;  %p60_p5 = scmp.lt.s32.totalorder %s54_s15, %s54_s15 }
   0xb   :  { %p61_p6 = por %p60_p5, %p59_p4 }
   0xd   :  { %p62_p7 = pnand %p61_p6, %p55_p3 }
   0xf   :  { %65 = shalt.err (!%p62_p7)
}
  0x10   :  { %17 = dma.hbm_to_vmem [thread:$0]  %s128_s0, 256, %s15_s7, [#allocation3]  }
  0x11   :  { %88 = dma.done.wait [#allocation3], 256  }
  0x12   :  { %89 = vsyncadd [#allocation3], 4294967040  ;;  %s93_s18 = smov [#allocation5]   ;;  %v21_v0 = vld [vmem:[#allocation2] sm:$0xff]  ;;  %v22_v1 = vld [vmem:[#allocation2 + $0x8] sm:$0xff] }
  0x13   :  { %s33_s19 = sshll.u32 %s93_s18, 4  ;;  %v23_v2 = vmul.f32 -1.0, %v21_v0  ;;  %v24_v3 = vmul.f32 -1.0, %v22_v1  ;;  %s34_s19 = int_to_ptr.vmem [resolvable:$true] %s33_s19 }
  0x14   :  { %s66_s20 = scalar_lea.vmem %s34_s19, 256  ;;  %p71_p9 = scmp.lt.s32.totalorder %s34_s19, %s34_s19 }
  0x15   :  { %25 = vst [vmem:[#allocation5] sm:$0xff] %v23_v2  ;;  %26 = vst [vmem:[#allocation5 + $0x8] sm:$0xff] %v24_v3  ;;  %p67_p8 = scmp.ne.s32.totalorder %s34_s19, %s66_s20  ;;  %p72_p10 = scmp.lt.s32.totalorder %s66_s20, %s66_s20 }
  0x17   :  { %p73_p11 = por %p72_p10, %p71_p9 }
  0x19   :  { %p74_p12 = pnand %p73_p11, %p67_p8 }
  0x1b   :  { %77 = shalt.err (!%p74_p12)
}
  0x1c   :  { %s78_s22 = scalar_lea.hbm %s129_s1, 256 }
  0x1d   :  { %p79_p13 = scmp.ne.s32.totalorder %s129_s1, %s78_s22  ;;  %p82_p0 = scmp.lt.u32.totalorder %s78_s22, %s129_s1 }
  0x1f   :  { %p84_p1 = pnand %p82_p0, %p79_p13 }
  0x21   :  { %87 = shalt.err (!%p84_p1)
}
  0x22   :  { %36 = dma.vmem_to_hbm [thread:$0]  %s34_s19, 256, %s129_s1, [#allocation4]  }
  0x23   :  { %90 = dma.done.wait [#allocation4], 256  }
  0x24   :  { %91 = vsyncadd [#allocation4], 4294967040 }
  0x25   :  { %40 = vsyncpa [#allocation3], 1 }
  0x26   :  { %41 = vsyncpa [#allocation4], 1 }

</bundles_post_ra>
